<compile_context>
chip_gen: v5e
topology: v5e:2x2
jax: 0.10.0
libtpu: 0.0.40
codegen_flags: <defaults>
</compile_context>

<pallas_src>
import jax
import jax.numpy as jnp
from jax import lax
from jax.experimental import pallas as pl
from jax.experimental.pallas import tpu as pltpu

LANE = 128


def _round_up(x, m):
    return ((x + m - 1) // m) * m


def _pick_tile(padded, align, cap):
    """Largest multiple of `align` that divides `padded` and is <= cap."""
    units = padded // align
    max_units = max(1, cap // align)
    best = 1
    for d in range(1, min(units, max_units) + 1):
        if units % d == 0:
            best = d
    return best * align


def dense_kernel(x_ref, w_ref, b_ref, o_ref):
    """Compute one (TM, TN) output tile; o_ref is the resident f32 accumulator.

    x_ref: (TM, TK)  activation tile (f32 or bf16)
    w_ref: (TK, TN)  weight tile in (D_in, D_out) layout (f32 or bf16)
    b_ref: (1, TN)   f32 bias tile
    o_ref: (TM, TN)  f32 output tile, resident across the K grid axis
    """
    @pl.when(pl.program_id(2) == 0)
    def _():
        # Initialize the resident output block with the bias (broadcast over rows).
        o_ref[...] = jnp.zeros_like(o_ref) + b_ref[...]

    # Plain A @ B (no per-tile weight transpose), f32 accumulation on the MXU.
    o_ref[...] += lax.dot_general(
        x_ref[...], w_ref[...],
        dimension_numbers=(((1,), (0,)), ((), ())),
        preferred_element_type=jnp.float32,
    )


def prepare_dense_params(weight, bias, *, stream_dtype=jnp.bfloat16):
    """One-time parameter preparation (outside the hot path).

    weight: (D_out, D_in) PyTorch layout; bias: (D_out,).
    Returns:
      w_prep: (Kp, Np) = (round_up(D_in,128), round_up(D_out,128)), stream_dtype
      b_prep: (1, Np) float32
    """
    D_out, D_in = weight.shape
    Kp = _round_up(D_in, LANE)
    Np = _round_up(D_out, LANE)

    w = weight.T  # (D_in, D_out): contract x dim 1 with w dim 0 inside the kernel.
    if (Kp, Np) != (D_in, D_out):
        w = jnp.pad(w, ((0, Kp - D_in), (0, Np - D_out)))
    w = w.astype(stream_dtype)

    b = bias
    if Np != D_out:
        b = jnp.pad(bias, (0, Np - D_out))
    b = b.astype(jnp.float32).reshape(1, Np)
    return w, b


def dense_forward(x, w_prep, b_prep, d_out):
    """x: (B, D_in); w_prep/b_prep from prepare_dense_params; d_out: true output dim.

    Returns (B, d_out, 1, 1), matching Dense.forward.
    """
    B, D_in = x.shape
    Kp, Np = w_prep.shape
    assert b_prep.shape == (1, Np)
    assert Kp >= D_in and Np >= d_out

    is_bf16 = (w_prep.dtype == jnp.bfloat16)
    m_align = 16 if is_bf16 else 8          # bf16 packs (16, 128) per vreg
    Mp = _round_up(B, m_align)

    # Only the (small) activation is padded per call; the weight is pre-padded.
    xp = x
    if (Mp, Kp) != (B, D_in):
        xp = jnp.pad(x, ((0, Mp - B), (0, Kp - D_in)))
    xp = xp.astype(w_prep.dtype)

    # Tiles are exact divisors of the padded extents (no over-padded grid work).
    TM = _pick_tile(Mp, m_align, 256)
    TK = _pick_tile(Kp, LANE, 1024)
    # Keep >=2 N blocks when possible so both v7x TensorCores get work.
    tn_cap = min(1024, Np // 2) if Np >= 2 * LANE else Np
    TN = _pick_tile(Np, LANE, tn_cap)

    grid = (Mp // TM, Np // TN, Kp // TK)

    flops = 2 * Mp * Np * Kp
    bytes_accessed = (
        xp.size * xp.dtype.itemsize
        + w_prep.size * w_prep.dtype.itemsize
        + b_prep.size * b_prep.dtype.itemsize
        + Mp * Np * 4
    )

    y = pl.pallas_call(
        dense_kernel,
        out_shape=jax.ShapeDtypeStruct((Mp, Np), jnp.float32),
        grid_spec=pltpu.PrefetchScalarGridSpec(
            num_scalar_prefetch=0,
            grid=grid,
            in_specs=[
                pl.BlockSpec((TM, TK), lambda i, j, k: (i, k)),   # activations
                # Weight is the large streamed operand; add
                # pipeline_mode=pl.Buffered(3) here if profiling shows exposed DMA.
                pl.BlockSpec((TK, TN), lambda i, j, k: (k, j)),   # weight (K, N)
                pl.BlockSpec((1, TN), lambda i, j, k: (0, j)),    # bias
            ],
            out_specs=pl.BlockSpec((TM, TN), lambda i, j, k: (i, j)),
        ),
        compiler_params=pltpu.CompilerParams(
            dimension_semantics=("parallel", "parallel", "arbitrary"),
            vmem_limit_bytes=48 * 1024 * 1024,
        ),
        cost_estimate=pl.CostEstimate(
            flops=flops, transcendentals=0, bytes_accessed=bytes_accessed),
    )(xp, w_prep, b_prep)

    # Strip padding, restore caller dtype, then glue: [..., None, None]
    y = y[:B, :d_out].astype(x.dtype)
    return y[..., None, None]


def _reference(x, weight, bias):
    y = jnp.dot(x, weight.T, precision=lax.Precision.HIGHEST) + bias
    return y[..., None, None]


if __name__ == "__main__":
    key = jax.random.PRNGKey(0)

    def make_params(k, d_in, d_out):
        kw, kb = jax.random.split(k)
        bound = 1.0 / (d_in ** 0.5)   # nn.Linear's U(-1/sqrt(in), 1/sqrt(in)) init
        w = jax.random.uniform(kw, (d_out, d_in), jnp.float32, -bound, bound)
        b = jax.random.uniform(kb, (d_out,), jnp.float32, -bound, bound)
        return w, b

    # --- Typical ScoreNet use: Dense(32, 64) on a small batch of embeddings ---
    k1, k2, key = jax.random.split(key, 3)
    B, D_in, D_out = 2, 32, 64
    weight, bias = make_params(k1, D_in, D_out)
    x = jax.random.normal(k2, (B, D_in), dtype=jnp.float32)
    ref = _reference(x, weight, bias)

    # Exact f32 streaming path.
    w32, b32 = prepare_dense_params(weight, bias, stream_dtype=jnp.float32)
    out32 = jax.block_until_ready(dense_forward(x, w32, b32, D_out))
    assert out32.shape == (B, D_out, 1, 1), out32.shape
    assert jnp.allclose(out32, ref, atol=1e-4, rtol=1e-4)

    # Default bf16 streaming path (f32 accumulation).
    wbf, bbf = prepare_dense_params(weight, bias)
    outbf = jax.block_until_ready(dense_forward(x, wbf, bbf, D_out))
    assert outbf.shape == (B, D_out, 1, 1), outbf.shape
    assert jnp.allclose(outbf, ref, atol=2e-2, rtol=2e-2)

    # --- Larger shape exercising padding, multi-step K accumulation, and
    #     multiple N blocks (cross-TensorCore parallelism on v7x) ---
    k1, k2, key = jax.random.split(key, 3)
    B2, D_in2, D_out2 = 4, 1500, 300   # Kp=1536 -> TK=768 (2 K steps); Np=384 -> TN=128 (3 N blocks)
    weight2, bias2 = make_params(k1, D_in2, D_out2)
    x2 = jax.random.normal(k2, (B2, D_in2), dtype=jnp.float32)
    ref2 = _reference(x2, weight2, bias2)

    w232, b232 = prepare_dense_params(weight2, bias2, stream_dtype=jnp.float32)
    out232 = jax.block_until_ready(dense_forward(x2, w232, b232, D_out2))
    assert out232.shape == (B2, D_out2, 1, 1), out232.shape
    assert jnp.allclose(out232, ref2, atol=1e-3, rtol=1e-3)

    w2bf, b2bf = prepare_dense_params(weight2, bias2)
    out2bf = jax.block_until_ready(dense_forward(x2, w2bf, b2bf, D_out2))
    assert jnp.allclose(out2bf, ref2, atol=5e-2, rtol=5e-2)

    print("KERNEL_OK")
</pallas_src>

<mosaic_0001>
module attributes {stable_mosaic.version = 11 : i64} {
  func.func @dense_kernel(%arg0: i32, %arg1: i32, %arg2: i32, %arg3: memref<8x128xf32, #tpu.memory_space<vmem>>, %arg4: memref<128x128xf32, #tpu.memory_space<vmem>>, %arg5: memref<1x128xf32, #tpu.memory_space<vmem>>, %arg6: memref<8x128xf32, #tpu.memory_space<vmem>>) attributes {dimension_semantics = [#tpu.dimension_semantics<parallel>, #tpu.dimension_semantics<parallel>, #tpu.dimension_semantics<arbitrary>], iteration_bounds = array<i64: 1, 1, 1>, scalar_prefetch = 0 : i64, scratch_operands = 0 : i64, tpu.core_type = #tpu.core_type<tc>, window_params = [{transform_indices = @transform_0, window_bounds = array<i64: 8, 128>}, {transform_indices = @transform_1, window_bounds = array<i64: 128, 128>}, {transform_indices = @transform_2, window_bounds = array<i64: 1, 128>}, {transform_indices = @transform_3, window_bounds = array<i64: 8, 128>}]} {
    %c0_i32 = arith.constant 0 : i32
    %0 = arith.cmpi eq, %arg2, %c0_i32 : i32
    %1 = arith.extui %0 : i1 to i32
    %c0_i32_0 = arith.constant 0 : i32
    %2 = arith.cmpi ne, %1, %c0_i32_0 : i32
    scf.if %2 {
      %cst_8 = arith.constant 0.000000e+00 : f32
      %9 = vector.broadcast %cst_8 : f32 to vector<8x128xf32>
      %c0_9 = arith.constant 0 : index
      %c0_10 = arith.constant 0 : index
      %10 = vector.load %arg5[%c0_9, %c0_10] : memref<1x128xf32, #tpu.memory_space<vmem>>, vector<1x128xf32>
      %11 = vector.broadcast %10 : vector<1x128xf32> to vector<8x128xf32>
      %12 = arith.addf %9, %11 : vector<8x128xf32>
      %c0_11 = arith.constant 0 : index
      %c0_12 = arith.constant 0 : index
      %13 = vector.load %arg6[%c0_11, %c0_12] : memref<8x128xf32, #tpu.memory_space<vmem>>, vector<8x128xf32>
      tpu.vector_store %arg6[%c0_11, %c0_12], %12 {strides = array<i32>} : memref<8x128xf32, #tpu.memory_space<vmem>>, vector<8x128xf32>,
    } else {
    }
    %c0 = arith.constant 0 : index
    %c0_1 = arith.constant 0 : index
    %3 = vector.load %arg6[%c0, %c0_1] : memref<8x128xf32, #tpu.memory_space<vmem>>, vector<8x128xf32>
    %c0_2 = arith.constant 0 : index
    %c0_3 = arith.constant 0 : index
    %4 = vector.load %arg3[%c0_2, %c0_3] : memref<8x128xf32, #tpu.memory_space<vmem>>, vector<8x128xf32>
    %c0_4 = arith.constant 0 : index
    %c0_5 = arith.constant 0 : index
    %5 = vector.load %arg4[%c0_4, %c0_5] : memref<128x128xf32, #tpu.memory_space<vmem>>, vector<128x128xf32>
    %cst = arith.constant dense<0.000000e+00> : vector<8x128xf32>
    %6 = tpu.matmul %4, %5, %cst {dimension_numbers = #tpu.dot_dimension_numbers<[1], [0], [0], [1], [0, 0, 1, 1], [], []>} : vector<8x128xf32>, vector<128x128xf32>, vector<8x128xf32> -> vector<8x128xf32>
    %7 = arith.addf %3, %6 : vector<8x128xf32>
    %c0_6 = arith.constant 0 : index
    %c0_7 = arith.constant 0 : index
    %8 = vector.load %arg6[%c0_6, %c0_7] : memref<8x128xf32, #tpu.memory_space<vmem>>, vector<8x128xf32>
    tpu.vector_store %arg6[%c0_6, %c0_7], %7 {strides = array<i32>} : memref<8x128xf32, #tpu.memory_space<vmem>>, vector<8x128xf32>,
    return
  }
  func.func @transform_0(%arg0: i32, %arg1: i32, %arg2: i32) -> (i32, i32) {
    %c0_i32 = arith.constant 0 : i32
    return %arg0, %arg2 : i32, i32
  }
  func.func @transform_1(%arg0: i32, %arg1: i32, %arg2: i32) -> (i32, i32) {
    %c0_i32 = arith.constant 0 : i32
    return %arg2, %arg1 : i32, i32
  }
  func.func @transform_2(%arg0: i32, %arg1: i32, %arg2: i32) -> (i32, i32) {
    %c0_i32 = arith.constant 0 : i32
    %c0_i32_0 = arith.constant 0 : i32
    return %c0_i32, %arg1 : i32, i32
  }
  func.func @transform_3(%arg0: i32, %arg1: i32, %arg2: i32) -> (i32, i32) {
    %c0_i32 = arith.constant 0 : i32
    return %arg0, %arg1 : i32, i32
  }
}

</mosaic_0001>

<bundles_post_ra>
// kernel: tpu_custom_call.1
= control target key start
LH: loop header
LB: loop body
LE: loop exit
PB: predicated region body
PF: predicated region fallthrough
CT: control target
= control target key end

     0   :  { %8 = vsyncpa [#allocation3], 0  ;;  %s234_s0 = inlined_call_operand.hbm [shape: f32[8,128], index: 0, kind: input, shape index: {}]   ;;  %s235_s1 = inlined_call_operand.hbm [shape: f32[128,128], index: 1, kind: input, shape index: {}]   ;;  %s236_s2 = inlined_call_operand.vmem [shape: f32[1,128], index: 2, kind: input, shape index: {}]   ;;  %s237_s3 = inlined_call_operand.hbm [shape: f32[8,128], index: 3, kind: output, shape index: {}]  }
   0x1   :  { %9 = vsyncpa [#allocation6], 0 }
   0x2   :  { %10 = vsyncpa [#allocation4], 0  ;;  %s16_s14 = sshll.u32 %s234_s0, 4  ;;  %s197_s15 = smov [#allocation2]   ;;  %s17_s14 = int_to_ptr.hbm [resolvable:$true] %s16_s14 }
   0x3   :  { %s18_s16 = sshll.u32 %s197_s15, 4  ;;  %s26_s19 = sshll.u32 %s235_s1, 4  ;;  %s19_s16 = int_to_ptr.vmem [resolvable:$true] %s18_s16  ;;  %s27_s19 = int_to_ptr.hbm [resolvable:$true] %s26_s19 }
   0x4   :  { %21 = dma.hbm_to_vmem [thread:$0]  %s17_s14, 128, %s19_s16, [#allocation3]  }
   0x5   :  { %s198_s20 = smov [#allocation5]   ;;  %s199_s22 = smov 128  }
   0x6   :  { %s28_s21 = sshll.u32 %s198_s20, 4  ;;  %s200_s23 = smov 8   ;;  %s29_s21 = int_to_ptr.vmem [resolvable:$true] %s28_s21 }
   0x7   :  { %34 = dma.hbm_to_vmem [thread:$0]  %s27_s19, 2048, %s29_s21, [#allocation6], %s199_s22, %s199_s22, %s200_s23  }
   0x8   :  { %191 = dma.done.wait [#allocation3], 128  }
   0x9   :  { %192 = vsyncadd [#allocation3], 4294967168 }
   0xa   :  { %193 = dma.done.wait [#allocation6], 2048  }
   0xb   :  { %194 = vsyncadd [#allocation6], 4294965248  ;;  %v72_v0 = vld [vmem:[#allocation5 + $0x78] sm:$0xff]  ;;  %v71_v1 = vld [vmem:[#allocation5 + $0x70] sm:$0xff]  ;;  %s201_s24 = smov [#allocation7]   ;;  %s102_s28 = sshll.u32 %s237_s3, 4  ;;  %s103_s28 = int_to_ptr.hbm [resolvable:$true] %s102_s28 }
   0xc   :  { %73 = vmatpush.msra.mxu0 %v72_v0  ;;  %v70_v2 = vld [vmem:[#allocation5 + $0x68] sm:$0xff]  ;;  %v69_v3 = vld [vmem:[#allocation5 + $0x60] sm:$0xff]  ;;  %v68_v4 = vld [vmem:[#allocation5 + $0x58] sm:$0xff]  ;;  %s100_s25 = sshll.u32 %s201_s24, 4  ;;  %s101_s25 = int_to_ptr.vmem [resolvable:$true] %s100_s25 }
   0xd   :  { %v67_v5 = vld [vmem:[#allocation5 + $0x50] sm:$0xff]  ;;  %v66_v6 = vld [vmem:[#allocation5 + $0x48] sm:$0xff]  ;;  %v65_v7 = vld [vmem:[#allocation5 + $0x40] sm:$0xff] }
   0xe   :  { %74 = vmatpush.msra.mxu0 %v71_v1  ;;  %v64_v8 = vld [vmem:[#allocation5 + $0x38] sm:$0xff]  ;;  %v63_v9 = vld [vmem:[#allocation5 + $0x30] sm:$0xff]  ;;  %v62_v10 = vld [vmem:[#allocation5 + $0x28] sm:$0xff] }
   0xf   :  { %v61_v11 = vld [vmem:[#allocation5 + $0x20] sm:$0xff]  ;;  %v60_v12 = vld [vmem:[#allocation5 + $0x18] sm:$0xff]  ;;  %v59_v13 = vld [vmem:[#allocation5 + $0x10] sm:$0xff] }
  0x10   :  { %75 = vmatpush.msra.mxu0 %v70_v2  ;;  %v58_v14 = vld [vmem:[#allocation5 + $0x8] sm:$0xff]  ;;  %v57_v15 = vld [vmem:[#allocation5] sm:$0xff]  ;;  %v56_v16 = vld [vmem:[#allocation2] sm:$0xff] }
  0x11   :  { %v118_v17 = vld [vmem:[%s236_s2] ss:$0 sm:$0xff] }
  0x12   :  { %76 = vmatpush.msra.mxu0 %v69_v3 }
  0x14   :  { %77 = vmatpush.msra.mxu0 %v68_v4 }
  0x16   :  { %78 = vmatpush.msra.mxu0 %v67_v5 }
  0x18   :  { %79 = vmatpush.msra.mxu0 %v66_v6 }
  0x1a   :  { %80 = vmatpush.msra.mxu0 %v65_v7 }
  0x1c   :  { %81 = vmatpush.msra.mxu0 %v64_v8 }
  0x1e   :  { %82 = vmatpush.msra.mxu0 %v63_v9 }
  0x20   :  { %83 = vmatpush.msra.mxu0 %v62_v10 }
  0x22   :  { %84 = vmatpush.msra.mxu0 %v61_v11 }
  0x24   :  { %85 = vmatpush.msra.mxu0 %v60_v12 }
  0x26   :  { %86 = vmatpush.msra.mxu0 %v59_v13 }
  0x28   :  { %87 = vmatpush.msra.mxu0 %v58_v14 }
  0x2a   :  { %88 = vmatpush.msra.mxu0 %v57_v15 }
  0x2b   :  { %89 = vmatmul.f32.vlgmr.msra.gmra.mxu0 %v56_v16 }
  0xa8   :  { %v90_v18 = vpop.f32.mrf.mxu0 }
  0xa9   :  { %v93_v19 = vadd.f32 %v118_v17, %v90_v18 }
  0xab   :  { %94 = vst [vmem:[#allocation7] sm:$0xff] %v93_v19 }
  0xac   :  { %105 = dma.vmem_to_hbm [thread:$0]  %s101_s25, 128, %s103_s28, [#allocation4]  }
  0xad   :  { %195 = dma.done.wait [#allocation4], 128  }
  0xae   :  { %196 = vsyncadd [#allocation4], 4294967168 }
  0xaf   :  { %110 = vsyncpa [#allocation3], 1 }
  0xb0   :  { %111 = vsyncpa [#allocation6], 1 }
  0xb1   :  { %112 = vsyncpa [#allocation4], 1 }

</bundles_post_ra>
